<compile_context>
chip_gen: v7x
topology: tpu7x:2x2x1
jax: 0.10.0
libtpu: 0.0.40
codegen_flags: <defaults>
</compile_context>

<pallas_src>
from functools import partial

import jax
import jax.numpy as jnp
import jax.scipy.linalg as jsl
from jax.experimental import pallas as pl
from jax.experimental.pallas import tpu as pltpu


def _round_up(n, m):
    return ((n + m - 1) // m) * m


def mlp_kernel(x_ref,
               w1_ref, b1_ref,
               w2_ref, b2_ref,
               w3_ref, b3_ref,
               w4t_ref, b4_ref,
               o_ref, *, p):
    # f32 x tile -> bf16 on the VPU (free: the kernel is MXU-cadence-bound).
    x = x_ref[...].astype(jnp.bfloat16)                      # [R, p*in_dim]

    # Layer 1: block-diag folded (Linear+BN) -> bias(f32) -> ReLU -> bf16
    h = jnp.dot(x, w1_ref[...], preferred_element_type=jnp.float32) + b1_ref[...]
    h = jnp.maximum(h, 0.0).astype(jnp.bfloat16)             # [R, p*64]

    # Layer 2
    h = jnp.dot(h, w2_ref[...], preferred_element_type=jnp.float32) + b2_ref[...]
    h = jnp.maximum(h, 0.0).astype(jnp.bfloat16)             # [R, p*32]

    # Layer 3
    h = jnp.dot(h, w3_ref[...], preferred_element_type=jnp.float32) + b3_ref[...]
    h = jnp.maximum(h, 0.0)                                  # [R, p*64] f32

    # Layer 4: Linear(64, 1) per packed group, kept off the MXU (its utilization
    # would be <2%).  VPU multiply + XLU 64-lane reduce per group; the MXU is the
    # binding unit so this is hidden.
    z = h * w4t_ref[...]                                     # [R, p*64] f32
    gw = z.shape[1] // p                                     # group width (64)
    for g in range(p):
        seg = jnp.sum(z[:, g * gw:(g + 1) * gw], axis=-1, keepdims=True) + b4_ref[...]
        o_ref[:, g:g + 1] = seg.astype(o_ref.dtype)


def mlp_forward(x, kparams, p=4, max_tile_rows=2048):
    """x: [B, in_dim] float32.  kparams: folded/packed operands.  Returns [B, 1] f32."""
    B, in_dim = x.shape
    packed_in = p * in_dim

    # Pad only up to the packing/sublane granule (p*8 = 32 rows); no-op for aligned B.
    # TODO(synk): for huge unaligned B, a masked remainder epilogue would avoid this copy.
    B_pad = _round_up(B, p * 8)
    if B_pad != B:
        x = jnp.pad(x, ((0, B_pad - B), (0, 0)))
    rows = B_pad // p
    xp = x.reshape(rows, packed_in)          # contiguous -> free layout change

    # Tile selection: big tiles to amortize grid overhead, but >=2 grid steps when
    # possible so v7x's two TensorCores both get work.  Last tile may be partial.
    num_tiles = pl.cdiv(rows, max_tile_rows)
    if num_tiles == 1 and rows >= 16:
        num_tiles = 2
    tile_rows = _round_up(pl.cdiv(rows, num_tiles), 8)
    grid = (pl.cdiv(rows, tile_rows),)

    operands = (
        xp,
        kparams["w1"], kparams["b1"],
        kparams["w2"], kparams["b2"],
        kparams["w3"], kparams["b3"],
        kparams["w4t"], kparams["b4"],
    )

    in_specs = [pl.BlockSpec((tile_rows, packed_in), lambda i: (i, 0))]
    for op in operands[1:]:
        # Weights/biases: full block, constant index_map -> stay VMEM-resident.
        in_specs.append(pl.BlockSpec(op.shape, lambda i: (0, 0)))

    out = pl.pallas_call(
        partial(mlp_kernel, p=p),
        out_shape=jax.ShapeDtypeStruct((rows, p), jnp.float32),
        grid=grid,
        in_specs=in_specs,
        out_specs=pl.BlockSpec((tile_rows, p), lambda i: (i, 0)),
        compiler_params=pltpu.CompilerParams(
            dimension_semantics=("parallel",),
            vmem_limit_bytes=32 * 1024 * 1024),
    )(*operands)

    return out.reshape(B_pad, 1)[:B]


def make_raw_params(key, in_dim):
    """Deterministic PyTorch-like parameters (Linear weights stored as [in, out])."""
    dims = [(in_dim, 64), (64, 32), (32, 64), (64, 1)]
    keys = jax.random.split(key, 16)
    raw = {}
    ki = 0
    for li, (din, dout) in enumerate(dims, start=1):
        bound = 1.0 / jnp.sqrt(din)
        raw[f"w{li}"] = jax.random.uniform(keys[ki], (din, dout), jnp.float32,
                                           -bound, bound); ki += 1
        raw[f"b{li}"] = jax.random.uniform(keys[ki], (1, dout), jnp.float32,
                                           -bound, bound); ki += 1
        if li < 4:
            raw[f"g{li}"] = 1.0 + 0.1 * jax.random.normal(keys[ki], (1, dout),
                                                          jnp.float32); ki += 1
            raw[f"be{li}"] = 0.1 * jax.random.normal(keys[ki], (1, dout),
                                                     jnp.float32); ki += 1
            raw[f"rm{li}"] = 0.05 * jnp.arange(dout, dtype=jnp.float32).reshape(1, dout)
            raw[f"rv{li}"] = 1.0 + 0.01 * jnp.arange(dout, dtype=jnp.float32).reshape(1, dout)
    return raw


def fold_params(raw, p=4, eps=1e-5):
    """Fold eval-mode BN + bias into the weights, then pack P batch rows into the
    lane axis via block-diagonal weights / tiled biases.  Weights -> bf16 (MXU path),
    biases stay f32."""
    kp = {}
    for li in (1, 2, 3):
        s = raw[f"g{li}"] / jnp.sqrt(raw[f"rv{li}"] + eps)   # [1, dout]
        t = raw[f"be{li}"] - raw[f"rm{li}"] * s              # [1, dout]
        w = raw[f"w{li}"] * s                                # [din, dout] f32
        b = raw[f"b{li}"] * s + t                            # [1, dout] f32
        kp[f"w{li}"] = jsl.block_diag(*([w] * p)).astype(jnp.bfloat16)  # [p*din, p*dout]
        kp[f"b{li}"] = jnp.tile(b, (1, p))                               # [1, p*dout]
    kp["w4t"] = jnp.tile(raw["w4"].T, (1, p))                # [1, p*64] f32 (VPU mul)
    kp["b4"] = raw["b4"]                                     # [1, 1] f32
    return kp


def mlp_ref(x, raw, eps=1e-5):
    """Pure-JAX f32 reference (Linear -> BN(eval) -> ReLU, x3 -> Linear)."""
    h = x
    for li in (1, 2, 3):
        h = h @ raw[f"w{li}"] + raw[f"b{li}"]
        h = (h - raw[f"rm{li}"]) / jnp.sqrt(raw[f"rv{li}"] + eps) \
            * raw[f"g{li}"] + raw[f"be{li}"]
        h = jnp.maximum(h, 0.0)
    return h @ raw["w4"] + raw["b4"]


if __name__ == "__main__":
    key = jax.random.PRNGKey(0)
    k_x, k_p = jax.random.split(key)

    B, in_dim = 8, 32
    x = jax.random.normal(k_x, (B, in_dim), dtype=jnp.float32)
    raw = make_raw_params(k_p, in_dim)
    kparams = fold_params(raw)

    out = mlp_forward(x, kparams)
    out = jax.block_until_ready(out)

    ref = mlp_ref(x, raw)
    assert out.shape == (B, 1), out.shape
    # bf16 inputs/weights on the MXU (f32 accumulation) -> slightly loosened tolerance.
    assert jnp.allclose(out, ref, atol=3e-2, rtol=3e-2), (out, ref)

    print("KERNEL_OK")
</pallas_src>

<mosaic_0001>
module attributes {stable_mosaic.version = 11 : i64} {
  func.func @mlp_kernel(%arg0: i32, %arg1: memref<8x128xf32, #tpu.memory_space<vmem>>, %arg2: memref<128x256xbf16, #tpu.memory_space<vmem>>, %arg3: memref<1x256xf32, #tpu.memory_space<vmem>>, %arg4: memref<256x128xbf16, #tpu.memory_space<vmem>>, %arg5: memref<1x128xf32, #tpu.memory_space<vmem>>, %arg6: memref<128x256xbf16, #tpu.memory_space<vmem>>, %arg7: memref<1x256xf32, #tpu.memory_space<vmem>>, %arg8: memref<1x256xf32, #tpu.memory_space<vmem>>, %arg9: memref<1x1xf32, #tpu.memory_space<vmem>>, %arg10: memref<8x4xf32, #tpu.memory_space<vmem>>) attributes {dimension_semantics = [#tpu.dimension_semantics<parallel>], iteration_bounds = array<i64: 1>, scalar_prefetch = 0 : i64, scratch_operands = 0 : i64, tpu.core_type = #tpu.core_type<tc>, window_params = [{transform_indices = @transform_0, window_bounds = array<i64: 8, 128>}, {pipeline_mode = #tpu.pipeline_mode<synchronous>, transform_indices = @transform_1, window_bounds = array<i64: 128, 256>}, {pipeline_mode = #tpu.pipeline_mode<synchronous>, transform_indices = @transform_2, window_bounds = array<i64: 1, 256>}, {pipeline_mode = #tpu.pipeline_mode<synchronous>, transform_indices = @transform_3, window_bounds = array<i64: 256, 128>}, {pipeline_mode = #tpu.pipeline_mode<synchronous>, transform_indices = @transform_4, window_bounds = array<i64: 1, 128>}, {pipeline_mode = #tpu.pipeline_mode<synchronous>, transform_indices = @transform_5, window_bounds = array<i64: 128, 256>}, {pipeline_mode = #tpu.pipeline_mode<synchronous>, transform_indices = @transform_6, window_bounds = array<i64: 1, 256>}, {pipeline_mode = #tpu.pipeline_mode<synchronous>, transform_indices = @transform_7, window_bounds = array<i64: 1, 256>}, {pipeline_mode = #tpu.pipeline_mode<synchronous>, transform_indices = @transform_8, window_bounds = array<i64: 1, 1>}, {transform_indices = @transform_9, window_bounds = array<i64: 8, 4>}]} {
    %c0 = arith.constant 0 : index
    %c0_0 = arith.constant 0 : index
    %0 = vector.load %arg1[%c0, %c0_0] : memref<8x128xf32, #tpu.memory_space<vmem>>, vector<8x128xf32>
    %1 = arith.truncf %0 : vector<8x128xf32> to vector<8x128xbf16>
    %c0_1 = arith.constant 0 : index
    %c0_2 = arith.constant 0 : index
    %2 = vector.load %arg2[%c0_1, %c0_2] : memref<128x256xbf16, #tpu.memory_space<vmem>>, vector<128x256xbf16>
    %cst = arith.constant dense<0.000000e+00> : vector<8x256xf32>
    %3 = tpu.matmul %1, %2, %cst {dimension_numbers = #tpu.dot_dimension_numbers<[1], [0], [0], [1], [0, 0, 1, 1], [], []>} : vector<8x128xbf16>, vector<128x256xbf16>, vector<8x256xf32> -> vector<8x256xf32>
    %c0_3 = arith.constant 0 : index
    %c0_4 = arith.constant 0 : index
    %4 = vector.load %arg3[%c0_3, %c0_4] : memref<1x256xf32, #tpu.memory_space<vmem>>, vector<1x256xf32>
    %5 = vector.broadcast %4 : vector<1x256xf32> to vector<8x256xf32>
    %6 = arith.addf %3, %5 : vector<8x256xf32>
    %cst_5 = arith.constant 0.000000e+00 : f32
    %7 = vector.broadcast %cst_5 : f32 to vector<8x256xf32>
    %8 = arith.maximumf %6, %7 : vector<8x256xf32>
    %9 = arith.truncf %8 : vector<8x256xf32> to vector<8x256xbf16>
    %c0_6 = arith.constant 0 : index
    %c0_7 = arith.constant 0 : index
    %10 = vector.load %arg4[%c0_6, %c0_7] : memref<256x128xbf16, #tpu.memory_space<vmem>>, vector<256x128xbf16>
    %cst_8 = arith.constant dense<0.000000e+00> : vector<8x128xf32>
    %11 = tpu.matmul %9, %10, %cst_8 {dimension_numbers = #tpu.dot_dimension_numbers<[1], [0], [0], [1], [0, 0, 1, 1], [], []>} : vector<8x256xbf16>, vector<256x128xbf16>, vector<8x128xf32> -> vector<8x128xf32>
    %c0_9 = arith.constant 0 : index
    %c0_10 = arith.constant 0 : index
    %12 = vector.load %arg5[%c0_9, %c0_10] : memref<1x128xf32, #tpu.memory_space<vmem>>, vector<1x128xf32>
    %13 = vector.broadcast %12 : vector<1x128xf32> to vector<8x128xf32>
    %14 = arith.addf %11, %13 : vector<8x128xf32>
    %cst_11 = arith.constant 0.000000e+00 : f32
    %15 = vector.broadcast %cst_11 : f32 to vector<8x128xf32>
    %16 = arith.maximumf %14, %15 : vector<8x128xf32>
    %17 = arith.truncf %16 : vector<8x128xf32> to vector<8x128xbf16>
    %c0_12 = arith.constant 0 : index
    %c0_13 = arith.constant 0 : index
    %18 = vector.load %arg6[%c0_12, %c0_13] : memref<128x256xbf16, #tpu.memory_space<vmem>>, vector<128x256xbf16>
    %cst_14 = arith.constant dense<0.000000e+00> : vector<8x256xf32>
    %19 = tpu.matmul %17, %18, %cst_14 {dimension_numbers = #tpu.dot_dimension_numbers<[1], [0], [0], [1], [0, 0, 1, 1], [], []>} : vector<8x128xbf16>, vector<128x256xbf16>, vector<8x256xf32> -> vector<8x256xf32>
    %c0_15 = arith.constant 0 : index
    %c0_16 = arith.constant 0 : index
    %20 = vector.load %arg7[%c0_15, %c0_16] : memref<1x256xf32, #tpu.memory_space<vmem>>, vector<1x256xf32>
    %21 = vector.broadcast %20 : vector<1x256xf32> to vector<8x256xf32>
    %22 = arith.addf %19, %21 : vector<8x256xf32>
    %cst_17 = arith.constant 0.000000e+00 : f32
    %23 = vector.broadcast %cst_17 : f32 to vector<8x256xf32>
    %24 = arith.maximumf %22, %23 : vector<8x256xf32>
    %c0_18 = arith.constant 0 : index
    %c0_19 = arith.constant 0 : index
    %25 = vector.load %arg8[%c0_18, %c0_19] : memref<1x256xf32, #tpu.memory_space<vmem>>, vector<1x256xf32>
    %26 = vector.broadcast %25 : vector<1x256xf32> to vector<8x256xf32>
    %27 = arith.mulf %24, %26 : vector<8x256xf32>
    %28 = vector.extract_strided_slice %27 {offsets = [0, 0], sizes = [8, 64], strides = [1, 1]} : vector<8x256xf32> to vector<8x64xf32>
    %cst_20 = arith.constant dense<0.000000e+00> : vector<8xf32>
    %29 = vector.multi_reduction <add>, %28, %cst_20 [1] : vector<8x64xf32> to vector<8xf32>
    %30 = vector.shape_cast %29 : vector<8xf32> to vector<8x1xf32>
    %c0_21 = arith.constant 0 : index
    %c0_22 = arith.constant 0 : index
    %31 = vector.load %arg9[%c0_21, %c0_22] : memref<1x1xf32, #tpu.memory_space<vmem>>, vector<1x1xf32>
    %32 = vector.broadcast %31 : vector<1x1xf32> to vector<8x1xf32>
    %33 = arith.addf %30, %32 : vector<8x1xf32>
    %c0_23 = arith.constant 0 : index
    %c0_24 = arith.constant 0 : index
    %34 = vector.load %arg10[%c0_23, %c0_24] : memref<8x4xf32, #tpu.memory_space<vmem>>, vector<8x1xf32>
    tpu.vector_store %arg10[%c0_23, %c0_24], %33 {strides = array<i32>} : memref<8x4xf32, #tpu.memory_space<vmem>>, vector<8x1xf32>,
    %35 = vector.extract_strided_slice %27 {offsets = [0, 64], sizes = [8, 64], strides = [1, 1]} : vector<8x256xf32> to vector<8x64xf32>
    %cst_25 = arith.constant dense<0.000000e+00> : vector<8xf32>
    %36 = vector.multi_reduction <add>, %35, %cst_25 [1] : vector<8x64xf32> to vector<8xf32>
    %37 = vector.shape_cast %36 : vector<8xf32> to vector<8x1xf32>
    %c0_26 = arith.constant 0 : index
    %c0_27 = arith.constant 0 : index
    %38 = vector.load %arg9[%c0_26, %c0_27] : memref<1x1xf32, #tpu.memory_space<vmem>>, vector<1x1xf32>
    %39 = vector.broadcast %38 : vector<1x1xf32> to vector<8x1xf32>
    %40 = arith.addf %37, %39 : vector<8x1xf32>
    %c0_28 = arith.constant 0 : index
    %c1 = arith.constant 1 : index
    %41 = vector.load %arg10[%c0_28, %c1] : memref<8x4xf32, #tpu.memory_space<vmem>>, vector<8x1xf32>
    tpu.vector_store %arg10[%c0_28, %c1], %40 {strides = array<i32>} : memref<8x4xf32, #tpu.memory_space<vmem>>, vector<8x1xf32>,
    %42 = vector.extract_strided_slice %27 {offsets = [0, 128], sizes = [8, 64], strides = [1, 1]} : vector<8x256xf32> to vector<8x64xf32>
    %cst_29 = arith.constant dense<0.000000e+00> : vector<8xf32>
    %43 = vector.multi_reduction <add>, %42, %cst_29 [1] : vector<8x64xf32> to vector<8xf32>
    %44 = vector.shape_cast %43 : vector<8xf32> to vector<8x1xf32>
    %c0_30 = arith.constant 0 : index
    %c0_31 = arith.constant 0 : index
    %45 = vector.load %arg9[%c0_30, %c0_31] : memref<1x1xf32, #tpu.memory_space<vmem>>, vector<1x1xf32>
    %46 = vector.broadcast %45 : vector<1x1xf32> to vector<8x1xf32>
    %47 = arith.addf %44, %46 : vector<8x1xf32>
    %c0_32 = arith.constant 0 : index
    %c2 = arith.constant 2 : index
    %48 = vector.load %arg10[%c0_32, %c2] : memref<8x4xf32, #tpu.memory_space<vmem>>, vector<8x1xf32>
    tpu.vector_store %arg10[%c0_32, %c2], %47 {strides = array<i32>} : memref<8x4xf32, #tpu.memory_space<vmem>>, vector<8x1xf32>,
    %49 = vector.extract_strided_slice %27 {offsets = [0, 192], sizes = [8, 64], strides = [1, 1]} : vector<8x256xf32> to vector<8x64xf32>
    %cst_33 = arith.constant dense<0.000000e+00> : vector<8xf32>
    %50 = vector.multi_reduction <add>, %49, %cst_33 [1] : vector<8x64xf32> to vector<8xf32>
    %51 = vector.shape_cast %50 : vector<8xf32> to vector<8x1xf32>
    %c0_34 = arith.constant 0 : index
    %c0_35 = arith.constant 0 : index
    %52 = vector.load %arg9[%c0_34, %c0_35] : memref<1x1xf32, #tpu.memory_space<vmem>>, vector<1x1xf32>
    %53 = vector.broadcast %52 : vector<1x1xf32> to vector<8x1xf32>
    %54 = arith.addf %51, %53 : vector<8x1xf32>
    %c0_36 = arith.constant 0 : index
    %c3 = arith.constant 3 : index
    %55 = vector.load %arg10[%c0_36, %c3] : memref<8x4xf32, #tpu.memory_space<vmem>>, vector<8x1xf32>
    tpu.vector_store %arg10[%c0_36, %c3], %54 {strides = array<i32>} : memref<8x4xf32, #tpu.memory_space<vmem>>, vector<8x1xf32>,
    return
  }
  func.func @transform_0(%arg0: i32) -> (i32, i32) {
    %c0_i32 = arith.constant 0 : i32
    %c0_i32_0 = arith.constant 0 : i32
    return %arg0, %c0_i32 : i32, i32
  }
  func.func @transform_1(%arg0: i32) -> (i32, i32) {
    %c0_i32 = arith.constant 0 : i32
    %c0_i32_0 = arith.constant 0 : i32
    %c0_i32_1 = arith.constant 0 : i32
    return %c0_i32, %c0_i32_0 : i32, i32
  }
  func.func @transform_2(%arg0: i32) -> (i32, i32) {
    %c0_i32 = arith.constant 0 : i32
    %c0_i32_0 = arith.constant 0 : i32
    %c0_i32_1 = arith.constant 0 : i32
    return %c0_i32, %c0_i32_0 : i32, i32
  }
  func.func @transform_3(%arg0: i32) -> (i32, i32) {
    %c0_i32 = arith.constant 0 : i32
    %c0_i32_0 = arith.constant 0 : i32
    %c0_i32_1 = arith.constant 0 : i32
    return %c0_i32, %c0_i32_0 : i32, i32
  }
  func.func @transform_4(%arg0: i32) -> (i32, i32) {
    %c0_i32 = arith.constant 0 : i32
    %c0_i32_0 = arith.constant 0 : i32
    %c0_i32_1 = arith.constant 0 : i32
    return %c0_i32, %c0_i32_0 : i32, i32
  }
  func.func @transform_5(%arg0: i32) -> (i32, i32) {
    %c0_i32 = arith.constant 0 : i32
    %c0_i32_0 = arith.constant 0 : i32
    %c0_i32_1 = arith.constant 0 : i32
    return %c0_i32, %c0_i32_0 : i32, i32
  }
  func.func @transform_6(%arg0: i32) -> (i32, i32) {
    %c0_i32 = arith.constant 0 : i32
    %c0_i32_0 = arith.constant 0 : i32
    %c0_i32_1 = arith.constant 0 : i32
    return %c0_i32, %c0_i32_0 : i32, i32
  }
  func.func @transform_7(%arg0: i32) -> (i32, i32) {
    %c0_i32 = arith.constant 0 : i32
    %c0_i32_0 = arith.constant 0 : i32
    %c0_i32_1 = arith.constant 0 : i32
    return %c0_i32, %c0_i32_0 : i32, i32
  }
  func.func @transform_8(%arg0: i32) -> (i32, i32) {
    %c0_i32 = arith.constant 0 : i32
    %c0_i32_0 = arith.constant 0 : i32
    %c0_i32_1 = arith.constant 0 : i32
    return %c0_i32, %c0_i32_0 : i32, i32
  }
  func.func @transform_9(%arg0: i32) -> (i32, i32) {
    %c0_i32 = arith.constant 0 : i32
    %c0_i32_0 = arith.constant 0 : i32
    return %arg0, %c0_i32 : i32, i32
  }
}

</mosaic_0001>

<bundles_post_ra>
// kernel: tpu_custom_call.1
= control target key start
LH: loop header
LB: loop body
LE: loop exit
PB: predicated region body
PF: predicated region fallthrough
CT: control target
= control target key end

     0   :  { %s1057_s0 = inlined_call_operand.hbm [shape: f32[8,128], index: 0, kind: input, shape index: {}]   ;;  %s1058_s1 = inlined_call_operand.hbm [shape: bf16[128,256], index: 1, kind: input, shape index: {}]   ;;  %s1059_s2 = inlined_call_operand.vmem [shape: f32[1,256], index: 2, kind: input, shape index: {}]   ;;  %s1060_s3 = inlined_call_operand.hbm [shape: bf16[256,128], index: 3, kind: input, shape index: {}]   ;;  %s1061_s4 = inlined_call_operand.vmem [shape: f32[1,128], index: 4, kind: input, shape index: {}]   ;;  %s1062_s5 = inlined_call_operand.hbm [shape: bf16[128,256], index: 5, kind: input, shape index: {}]   ;;  %s1063_s6 = inlined_call_operand.vmem [shape: f32[1,256], index: 6, kind: input, shape index: {}]   ;;  %s1064_s7 = inlined_call_operand.vmem [shape: f32[1,256], index: 7, kind: input, shape index: {}]   ;;  %s1065_s8 = inlined_call_operand.<no memory space> [shape: f32[1,1], index: 8, kind: input, shape index: {}]   ;;  %s1066_s9 = inlined_call_operand.vmem [shape: f32[8,4], index: 9, kind: output, shape index: {}]  }
   0x1   :  { %v14_v0 = vstv %s1065_s8 }
   0x2   :  { %15 = vst [vmem:[#allocation2] sm:$0x1] %v14_v0 }
   0x3   :  { %16 = vsyncpa [#allocation4], 0 }
   0x4   :  { %17 = vsyncpa [#allocation6], 0 }
   0x5   :  { %18 = vsyncpa [#allocation9], 0  ;;  %s910_s11 = smov [#allocation5]   ;;  %s816_s15 = scalar_lea.hbm %s1058_s1, 2048 }
   0x6   :  { %s34_s12 = sshll.u32 %s910_s11, 4  ;;  %p817_p0 = scmp.ne.s32.totalorder %s1058_s1, %s816_s15  ;;  %s35_s12 = int_to_ptr.vmem [resolvable:$true] %s34_s12 }
   0x7   :  { %p820_p1 = scmp.lt.u32.totalorder %s816_s15, %s1058_s1 }
   0x9   :  { %p822_p2 = pnand %p820_p1, %p817_p0 }
   0xb   :  { %825 = shalt.err (!%p822_p2)
}
   0xc   :  { %s826_s8 = scalar_lea.vmem %s35_s12, 2048  ;;  %p831_p4 = scmp.lt.s32.totalorder %s35_s12, %s35_s12 }
   0xd   :  { %p827_p3 = scmp.ne.s32.totalorder %s35_s12, %s826_s8  ;;  %p832_p5 = scmp.lt.s32.totalorder %s826_s8, %s826_s8 }
   0xf   :  { %p833_p6 = por %p832_p5, %p831_p4 }
  0x11   :  { %p834_p7 = pnand %p833_p6, %p827_p3 }
  0x13   :  { %837 = shalt.err (!%p834_p7)
}
  0x14   :  { %s911_s20 = smov 128   ;;  %s912_s21 = smov 8  }
  0x15   :  { %40 = dma.hbm_to_vmem [thread:$0]  %s1058_s1, 2048, %s35_s12, [#allocation6], %s911_s20, %s911_s20, %s912_s21  }
  0x16   :  { %s913_s24 = smov [#allocation3]   ;;  %s914_s26 = smov [#allocation7]  }
  0x17   :  { %s25_s25 = sshll.u32 %s913_s24, 4  ;;  %s48_s27 = sshll.u32 %s914_s26, 4  ;;  %s26_s25 = int_to_ptr.vmem [resolvable:$true] %s25_s25  ;;  %s49_s27 = int_to_ptr.vmem [resolvable:$true] %s48_s27 }
  0x18   :  { %s838_s30 = scalar_lea.hbm %s1057_s0, 128 }
  0x19   :  { %p839_p8 = scmp.ne.s32.totalorder %s1057_s0, %s838_s30  ;;  %p842_p9 = scmp.lt.u32.totalorder %s838_s30, %s1057_s0 }
  0x1b   :  { %p844_p10 = pnand %p842_p9, %p839_p8 }
  0x1d   :  { %847 = shalt.err (!%p844_p10)
}
  0x1e   :  { %s848_s1 = scalar_lea.vmem %s26_s25, 128  ;;  %p853_p12 = scmp.lt.s32.totalorder %s26_s25, %s26_s25 }
  0x1f   :  { %p849_p11 = scmp.ne.s32.totalorder %s26_s25, %s848_s1  ;;  %p854_p13 = scmp.lt.s32.totalorder %s848_s1, %s848_s1 }
  0x21   :  { %p855_p0 = por %p854_p13, %p853_p12 }
  0x23   :  { %p856_p1 = pnand %p855_p0, %p849_p11 }
  0x25   :  { %859 = shalt.err (!%p856_p1)
}
  0x26   :  { %28 = dma.hbm_to_vmem [thread:$0]  %s1057_s0, 128, %s26_s25, [#allocation4]  }
  0x27   :  { %s860_s18 = scalar_lea.hbm %s1060_s3, 2048 }
  0x28   :  { %p861_p2 = scmp.ne.s32.totalorder %s1060_s3, %s860_s18  ;;  %p864_p3 = scmp.lt.u32.totalorder %s860_s18, %s1060_s3 }
  0x2a   :  { %p866_p4 = pnand %p864_p3, %p861_p2 }
  0x2c   :  { %869 = shalt.err (!%p866_p4)
}
  0x2d   :  { %s870_s24 = scalar_lea.vmem %s49_s27, 2048  ;;  %p875_p6 = scmp.lt.s32.totalorder %s49_s27, %s49_s27 }
  0x2e   :  { %p871_p5 = scmp.ne.s32.totalorder %s49_s27, %s870_s24  ;;  %p876_p7 = scmp.lt.s32.totalorder %s870_s24, %s870_s24 }
  0x30   :  { %p877_p8 = por %p876_p7, %p875_p6 }
  0x32   :  { %p878_p9 = pnand %p877_p8, %p871_p5 }
  0x34   :  { %881 = shalt.err (!%p878_p9)
}
  0x35   :  { %s915_s0 = smov 64   ;;  %s916_s25 = smov 4  }
  0x36   :  { %54 = dma.hbm_to_vmem [thread:$0]  %s1060_s3, 2048, %s49_s27, [#allocation6], %s915_s0, %s915_s0, %s916_s25  }
  0x37   :  { %s917_s29 = smov [#allocation8]   ;;  %s882_s13 = scalar_lea.hbm %s1062_s5, 2048 }
  0x38   :  { %s62_s30 = sshll.u32 %s917_s29, 4  ;;  %p883_p10 = scmp.ne.s32.totalorder %s1062_s5, %s882_s13  ;;  %s63_s30 = int_to_ptr.vmem [resolvable:$true] %s62_s30 }
  0x39   :  { %p886_p11 = scmp.lt.u32.totalorder %s882_s13, %s1062_s5 }
  0x3b   :  { %p888_p12 = pnand %p886_p11, %p883_p10 }
  0x3d   :  { %891 = shalt.err (!%p888_p12)
}
  0x3e   :  { %s892_s16 = scalar_lea.vmem %s63_s30, 2048  ;;  %p897_p0 = scmp.lt.s32.totalorder %s63_s30, %s63_s30 }
  0x3f   :  { %p893_p13 = scmp.ne.s32.totalorder %s63_s30, %s892_s16  ;;  %p898_p1 = scmp.lt.s32.totalorder %s892_s16, %s892_s16 }
  0x41   :  { %p899_p2 = por %p898_p1, %p897_p0 }
  0x43   :  { %p900_p3 = pnand %p899_p2, %p893_p13 }
  0x45   :  { %903 = shalt.err (!%p900_p3)
}
  0x46   :  { %68 = dma.hbm_to_vmem [thread:$0]  %s1062_s5, 2048, %s63_s30, [#allocation9], %s911_s20, %s911_s20, %s912_s21  }
  0x47   :  { %904 = dma.done.wait [#allocation4], 128  }
  0x48   :  { %905 = vsyncadd [#allocation4], 4294967168 }
  0x49   :  { %906 = dma.done.wait [#allocation6], 4096  }
  0x4a   :  { %907 = vsyncadd [#allocation6], 4294963200 }
  0x4b   :  { %908 = dma.done.wait [#allocation9], 2048  }
  0x4c   :  { %909 = vsyncadd [#allocation9], 4294965248  ;;  %v918_v1 = vmov 0   ;;  %v752_v2 = vld [vmem:[#allocation5 + $0x4] ss:$8 sps:$4 sm:$0xff]   ;;  %v780_v16 = vld [vmem:[#allocation7 + $0x50] sm:$0xff]   ;;  %v108_v48 = vlaneseq }
  0x4d   :  { %230 = vmatprep.mubr.bf16.mxu0 %v918_v1  ;;  %v754_v3 = vld [vmem:[#allocation5] ss:$8 sps:$4 sm:$0xff]   ;;  %198 = vmatprep.subr.bf16.mxu0 %v752_v2  ;;  %v755_v4 = vld [vmem:[#allocation5 + $0x14] ss:$8 sps:$4 sm:$0xff]   ;;  %v757_v5 = vld [vmem:[#allocation5 + $0x10] ss:$8 sps:$4 sm:$0xff]  }
  0x4e   :  { %199 = vmatpush1.bf16.msra.mxu0 %v754_v3  ;;  %v758_v6 = vld [vmem:[#allocation5 + $0x24] ss:$8 sps:$4 sm:$0xff]   ;;  %v760_v7 = vld [vmem:[#allocation5 + $0x20] ss:$8 sps:$4 sm:$0xff]   ;;  %v761_v8 = vld [vmem:[#allocation5 + $0x34] ss:$8 sps:$4 sm:$0xff]  }
  0x4f   :  { %200 = vmatprep.subr.bf16.mxu0 %v755_v4  ;;  %v763_v9 = vld [vmem:[#allocation5 + $0x30] ss:$8 sps:$4 sm:$0xff]   ;;  %v764_v10 = vld [vmem:[#allocation5 + $0x44] ss:$8 sps:$4 sm:$0xff]   ;;  %v766_v13 = vld [vmem:[#allocation5 + $0x40] ss:$8 sps:$4 sm:$0xff]  }
  0x50   :  { %v776_v11 = vld [vmem:[#allocation7 + $0x40] sm:$0xff]   ;;  %v778_v14 = vld [vmem:[#allocation7 + $0x48] sm:$0xff]   ;;  %v767_v17 = vld [vmem:[#allocation5 + $0x54] ss:$8 sps:$4 sm:$0xff]   ;;  %v109_v49 = vshrl.u32 %v108_v48, 7  ;;  %vm585_vm0 = vcmask 523264  }
  0x51   :  { %v777_v12 = vld [vmem:[#allocation7] sm:$0xff]   ;;  %718 = vmatprep.subr.bf16.mxu1 %v776_v11  ;;  %v779_v15 = vld [vmem:[#allocation7 + $0x8] sm:$0xff]   ;;  %v769_v18 = vld [vmem:[#allocation5 + $0x50] ss:$8 sps:$4 sm:$0xff]   ;;  %vm597_vm1 = vcmask 7168   ;;  %s920_s22 = smov 1  }
  0x52   :  { %201 = vmatpush1.bf16.msra.mxu0 %v757_v5  ;;  %719 = vmatpush3.bf16.msra.mxu1 %v777_v12  ;;  %v781_v19 = vld [vmem:[#allocation7 + $0x10] sm:$0xff]   ;;  %v782_v20 = vld [vmem:[#allocation7 + $0x58] sm:$0xff]   ;;  %v770_v21 = vld [vmem:[#allocation5 + $0x64] ss:$8 sps:$4 sm:$0xff]   ;;  %v110_v50 = vsub.s32 0, %v109_v49  ;;  %v114_v52 = vsub.s32 1, %v109_v49 }
  0x53   :  { %202 = vmatprep.subr.bf16.mxu0 %v758_v6  ;;  %720 = vmatprep.subr.bf16.mxu1 %v778_v14  ;;  %v772_v22 = vld [vmem:[#allocation5 + $0x60] ss:$8 sps:$4 sm:$0xff]   ;;  %v773_v23 = vld [vmem:[#allocation5 + $0x74] ss:$8 sps:$4 sm:$0xff]   ;;  %v775_v27 = vld [vmem:[#allocation5 + $0x70] ss:$8 sps:$4 sm:$0xff]  }
  0x54   :  { %v783_v24 = vld [vmem:[#allocation7 + $0x18] sm:$0xff]   ;;  %v784_v25 = vld [vmem:[#allocation7 + $0x60] sm:$0xff]   ;;  %v786_v29 = vld [vmem:[#allocation7 + $0x68] sm:$0xff]   ;;  %s921_s23 = smov 3   ;;  %vm618_vm2 = vcmask 15368   ;;  %vm635_vm3 = vcmask 23568  }
  0x55   :  { %v785_v26 = vld [vmem:[#allocation7 + $0x20] sm:$0xff]   ;;  %v88_v28 = vld [vmem:[#allocation3] sm:$0xff]  ;;  %v787_v30 = vld [vmem:[#allocation7 + $0x28] sm:$0xff]   ;;  %vm656_vm4 = vcmask 31768  }
  0x56   :  { %203 = vmatpush1.bf16.msra.mxu0 %v760_v7  ;;  %721 = vmatpush3.bf16.msra.mxu1 %v779_v15  ;;  %v89_v31 = vpack.c.bf16 %v88_v28, %v88_v28  ;;  %v788_v32 = vld [vmem:[#allocation7 + $0x70] sm:$0xff]   ;;  %v790_v34 = vld [vmem:[#allocation7 + $0x78] sm:$0xff]   ;;  %v792_v36 = vld [vmem:[#allocation8] ss:$8 sps:$4 sm:$0xff]  }
  0x57   :  { %204 = vmatprep.subr.bf16.mxu0 %v761_v8  ;;  %722 = vmatprep.subr.bf16.mxu1 %v780_v16  ;;  %v789_v33 = vld [vmem:[#allocation7 + $0x30] sm:$0xff]   ;;  %v791_v35 = vld [vmem:[#allocation7 + $0x38] sm:$0xff]   ;;  %v794_v37 = vld [vmem:[#allocation8 + $0x4] ss:$8 sps:$4 sm:$0xff]  }
  0x58   :  { %v797_v38 = vld [vmem:[#allocation8 + $0x14] ss:$8 sps:$4 sm:$0xff]   ;;  %v795_v39 = vld [vmem:[#allocation8 + $0x10] ss:$8 sps:$4 sm:$0xff]   ;;  %v800_v40 = vld [vmem:[#allocation8 + $0x24] ss:$8 sps:$4 sm:$0xff]  }
  0x59   :  { %v798_v41 = vld [vmem:[#allocation8 + $0x20] ss:$8 sps:$4 sm:$0xff]   ;;  %v803_v42 = vld [vmem:[#allocation8 + $0x34] ss:$8 sps:$4 sm:$0xff]   ;;  %v801_v43 = vld [vmem:[#allocation8 + $0x30] ss:$8 sps:$4 sm:$0xff]  }
  0x5a   :  { %205 = vmatpush1.bf16.msra.mxu0 %v763_v9  ;;  %723 = vmatpush3.bf16.msra.mxu1 %v781_v19  ;;  %v806_v44 = vld [vmem:[#allocation8 + $0x44] ss:$8 sps:$4 sm:$0xff]   ;;  %v804_v45 = vld [vmem:[#allocation8 + $0x40] ss:$8 sps:$4 sm:$0xff]   ;;  %v809_v46 = vld [vmem:[#allocation8 + $0x54] ss:$8 sps:$4 sm:$0xff]  }
  0x5b   :  { %206 = vmatprep.subr.bf16.mxu0 %v764_v10  ;;  %724 = vmatprep.subr.bf16.mxu1 %v782_v20  ;;  %v807_v47 = vld [vmem:[#allocation8 + $0x50] ss:$8 sps:$4 sm:$0xff]   ;;  %v810_v2 = vld [vmem:[#allocation8 + $0x60] ss:$8 sps:$4 sm:$0xff]   ;;  %v815_v3 = vld [vmem:[#allocation8 + $0x74] ss:$8 sps:$4 sm:$0xff]  }
  0x5c   :  { %v106_v51 = vld [vmem:[%s1059_s2] sm:$0x3] }
  0x5d   :  { %v111_v53 = vrot.slane %v106_v51, %v110_v50  ;;  %v115_v54 = vrot.slane %v106_v51, %v114_v52  ;;  %v813_v4 = vld [vmem:[#allocation8 + $0x70] ss:$8 sps:$4 sm:$0xff]   ;;  %v681_v6 = vld [vmem:[%s1061_s4] ss:$0 sm:$0xff]  ;;  %s919_s4 = smov 2  }
  0x5e   :  { %207 = vmatpush1.bf16.msra.mxu0 %v766_v13  ;;  %725 = vmatpush3.bf16.msra.mxu1 %v783_v24  ;;  %v436_v14 = vld [vmem:[%s1063_s6] sm:$0x3] }
  0x5f   :  { %208 = vmatprep.subr.bf16.mxu0 %v767_v17  ;;  %726 = vmatprep.subr.bf16.mxu1 %v784_v25  ;;  %v441_v15 = vrot.slane %v436_v14, %v110_v50  ;;  %v445_v16 = vrot.slane %v436_v14, %v114_v52  ;;  %v571_v17 = vld [vmem:[%s1064_s7] sm:$0x3] }
  0x60   :  { %v580_v28 = vrot.slane %v571_v17, %v114_v52 }
  0x62   :  { %209 = vmatpush1.bf16.msra.mxu0 %v769_v18  ;;  %727 = vmatpush3.bf16.msra.mxu1 %v785_v26 }
  0x63   :  { %210 = vmatprep.subr.bf16.mxu0 %v770_v21  ;;  %728 = vmatprep.subr.bf16.mxu1 %v786_v29  ;;  %v576_v21 = vrot.slane %v571_v17, %v110_v50 }
  0x66   :  { %211 = vmatpush1.bf16.msra.mxu0 %v772_v22  ;;  %729 = vmatpush3.bf16.msra.mxu1 %v787_v30 }
  0x67   :  { %212 = vmatprep.subr.bf16.mxu0 %v773_v23  ;;  %730 = vmatprep.subr.bf16.mxu1 %v788_v32 }
  0x6a   :  { %213 = vmatpush1.bf16.msra.mxu0 %v775_v27  ;;  %731 = vmatpush3.bf16.msra.mxu1 %v789_v33 }
  0x6b   :  { %732 = vmatprep.subr.bf16.mxu1 %v790_v34  ;;  %528 = vmatprep.subr.bf16.mxu0 %v794_v37  ;;  %v715_v37 = vld [vmem:[#allocation2] ss:$0 sm:$0xff] }
  0x6d   :  { %231 = vmatmul.mubr.bf16.vlgmr.msra.gmra.mrb[0].mxu0 %v89_v31 }
  0x6e   :  { %560 = vmatprep.mubr.bf16.mxu0 %v918_v1  ;;  %733 = vmatpush3.bf16.msra.mxu1 %v791_v35  ;;  %v812_v1 = vld [vmem:[#allocation8 + $0x64] ss:$8 sps:$4 sm:$0xff]  }
  0x6f   :  { %529 = vmatpush1.bf16.msra.mxu0 %v792_v36 }
  0x70   :  { %530 = vmatprep.subr.bf16.mxu0 %v797_v38 }
  0x73   :  { %531 = vmatpush1.bf16.msra.mxu0 %v795_v39 }
  0x74   :  { %532 = vmatprep.subr.bf16.mxu0 %v800_v40 }
  0x77   :  { %533 = vmatpush1.bf16.msra.mxu0 %v798_v41 }
  0x78   :  { %534 = vmatprep.subr.bf16.mxu0 %v803_v42 }
  0x7b   :  { %535 = vmatpush1.bf16.msra.mxu0 %v801_v43 }
  0x7c   :  { %536 = vmatprep.subr.bf16.mxu0 %v806_v44 }
  0x7f   :  { %537 = vmatpush1.bf16.msra.mxu0 %v804_v45 }
  0x80   :  { %538 = vmatprep.subr.bf16.mxu0 %v809_v46 }
  0x83   :  { %539 = vmatpush1.bf16.msra.mxu0 %v807_v47 }
  0x84   :  { %540 = vmatprep.subr.bf16.mxu0 %v812_v1 }
  0x87   :  { %541 = vmatpush1.bf16.msra.mxu0 %v810_v2 }
  0x88   :  { %542 = vmatprep.subr.bf16.mxu0 %v815_v3 }
  0x8b   :  { %543 = vmatpush1.bf16.msra.mxu0 %v813_v4 }
 0x140   :  { %v232_v55 = vpop.f32.mrb[0].mxu0 }
 0x141   :  { %v233_v56 = vadd.f32 %v232_v55, %v111_v53  ;;  %v234_v57 = vpop.f32.mrb[1].mxu0 }
 0x142   :  { %v235_v58 = vadd.f32 %v234_v57, %v115_v54  ;;  %v236_v59 = vpop.f32.mrb[2].mxu0 }
 0x143   :  { %v239_v60 = vmax.f32 %v233_v56, 0.0  ;;  %v237_v61 = vpop.f32.mrb[3].mxu0 }
 0x144   :  { %v240_v62 = vmax.f32 %v235_v58, 0.0 }
 0x145   :  { %v241_v0 = vpack.c.bf16 %v239_v60, %v239_v60 }
 0x146   :  { %v242_v63 = vpack.c.bf16 %v240_v62, %v240_v62 }
 0x148   :  { %410 = vmatprep.mubr.bf16.mxu1 %v242_v63 }
 0x149   :  { %411 = vmatmul.mubr.bf16.vlgmr.msra.gmra.mrb[0].mxu1 %v241_v0 }
 0x21c   :  { %v734_v5 = vpop.f32.mrb[0].mxu1 }
 0x21d   :  { %v735_v7 = vpop.f32.mrb[1].mxu1 }
 0x21e   :  { %v736_v8 = vadd.f32 %v735_v7, %v734_v5  ;;  %v737_v9 = vpop.f32.mrb[2].mxu1 }
 0x21f   :  { %v738_v10 = vpop.f32.mrb[3].mxu1 }
 0x220   :  { %v413_v11 = vadd.f32 %v736_v8, %v681_v6 }
 0x222   :  { %v418_v12 = vmax.f32 %v413_v11, 0.0 }
 0x224   :  { %v419_v13 = vpack.c.bf16 %v418_v12, %v418_v12 }
 0x226   :  { %561 = vmatmul.mubr.bf16.vlgmr.msra.gmra.mrb[4].mxu0 %v419_v13 }
 0x2f9   :  { %v562_v18 = vpop.f32.mrb[4].mxu0 }
 0x2fa   :  { %v563_v19 = vadd.f32 %v562_v18, %v441_v15  ;;  %v564_v20 = vpop.f32.mrb[5].mxu0 }
 0x2fb   :  { %v565_v22 = vadd.f32 %v564_v20, %v445_v16  ;;  %v566_v23 = vpop.f32.mrb[6].mxu0 }
 0x2fc   :  { %v569_v24 = vmax.f32 %v563_v19, 0.0  ;;  %v567_v25 = vpop.f32.mrb[7].mxu0 }
 0x2fd   :  { %v570_v26 = vmax.f32 %v565_v22, 0.0 }
 0x2fe   :  { %v583_v27 = vmul.f32 %v576_v21, %v569_v24 }
 0x2ff   :  { %v584_v29 = vmul.f32 %v580_v28, %v570_v26 }
 0x300   :  { %600 = vrot.lane.b32.xlu0 %v583_v27, %s915_s0  ;;  %v586_v35 = vsel %vm585_vm0, %v583_v27, 0.0 }
 0x301   :  { %v620_v33 = vsel %vm585_vm0, %v584_v29, 0.0 }
 0x304   :  { %638 = vrot.lane.b32.xlu0 %v584_v29, %s915_s0 }
 0x372   :  { %v601_v30 = vpop.permute.xlu0 %600 }
 0x373   :  { %v603_v31 = vsel %vm585_vm0, %v601_v30, 0.0 }
 0x374   :  { %604 = vadd.xlane.f32.xlu1 %v603_v31 }
 0x376   :  { %v639_v32 = vpop.permute.xlu0 %638 }
 0x377   :  { %v641_v34 = vsel %vm585_vm0, %v639_v32, 0.0 }
 0x378   :  { %621 = vadd.xlane.f32.xlu1 %v620_v33  ;;  %642 = vadd.xlane.f32.xlu0 %v641_v34 }
 0x37c   :  { %587 = vadd.xlane.f32.xlu1 %v586_v35 }
 0x401   :  { %v605_v36 = vpop.xlane.xlu1 %604 }
 0x402   :  { %v613_v41 = vadd.f32 %v715_v37, %v605_v36 }
 0x405   :  { %v622_v38 = vpop.xlane.xlu1 %621  ;;  %v643_v43 = vpop.xlane.xlu0 %642 }
 0x406   :  { %v630_v39 = vadd.f32 %v715_v37, %v622_v38  ;;  %v651_v44 = vadd.f32 %v715_v37, %v643_v43 }
 0x408   :  { %632 = vrot.lane.b32.xlu1 %v630_v39, %s919_s4 }
 0x409   :  { %v588_v40 = vpop.xlane.xlu1 %587 }
 0x40a   :  { %v596_v42 = vadd.f32 %v715_v37, %v588_v40 }
 0x40c   :  { %598 = vst.msk [vmem:[%s1066_s9] sm:$0xff] %vm597_vm1, %v596_v42  ;;  %615 = vrot.lane.b32.xlu1 %v613_v41, %s920_s22 }
 0x410   :  { %653 = vrot.lane.b32.xlu1 %v651_v44, %s921_s23 }
 0x47a   :  { %v633_v45 = vpop.permute.xlu1 %632 }
 0x47e   :  { %v616_v46 = vpop.permute.xlu1 %615 }
 0x47f   :  { %619 = vst.msk [vmem:[%s1066_s9] sm:$0xff] %vm618_vm2, %v616_v46 }
 0x480   :  { %636 = vst.msk [vmem:[%s1066_s9] sm:$0xff] %vm635_vm3, %v633_v45 }
 0x482   :  { %v654_v47 = vpop.permute.xlu1 %653 }
 0x483   :  { %657 = vst.msk [vmem:[%s1066_s9] sm:$0xff] %vm656_vm4, %v654_v47 }
 0x484   :  { %662 = vsyncpa [#allocation4], 1 }
 0x485   :  { %663 = vsyncpa [#allocation6], 1 }
 0x486   :  { %664 = vsyncpa [#allocation9], 1 }

</bundles_post_ra>
